<compile_context>
chip_gen: v7x
topology: tpu7x:2x2x1
jax: 0.10.0
libtpu: 0.0.40
codegen_flags: <defaults>
</compile_context>

<pallas_src>
import functools
import math

import jax
import jax.numpy as jnp
from jax.experimental import pallas as pl
from jax.experimental.pallas import tpu as pltpu


# ----------------------------------------------------------------------------
# Pallas kernel: 2-layer tanh MLP trunk + fused mean/sigma head + reparameterized
# sample, all VMEM-resident for one batch tile.
# ----------------------------------------------------------------------------
def gaussian_sampler_kernel(
    x_ref,      # (TB, D0)      bf16
    w1_ref,     # (D0, D1)      bf16
    b1_ref,     # (1,  D1)      f32
    w2_ref,     # (D1, D2)      bf16
    b2_ref,     # (1,  D2)      f32
    wh_ref,     # (D2, 2*DO)    bf16   [mean | log-sigma] fused head weight
    bh_ref,     # (1,  2*DO)    f32    [mean | log-sigma] fused head bias
    eps_ref,    # (TB, DO)      f32    unit-Gaussian noise
    out_ref,    # (TB, DO)      f32
    *,
    d_out,
):
    # h_network: Linear -> Tanh -> Linear -> Tanh
    # bf16 MXU inputs, f32 accumulation; tanh in f32 (VPU/EUP, v5e-safe).
    h = jnp.tanh(
        jnp.dot(x_ref[...], w1_ref[...], preferred_element_type=jnp.float32)
        + b1_ref[...]
    )
    h = jnp.tanh(
        jnp.dot(h.astype(jnp.bfloat16), w2_ref[...],
                preferred_element_type=jnp.float32)
        + b2_ref[...]
    )

    # Fused heads: one wider matmul instead of two narrow ones.
    z = (
        jnp.dot(h.astype(jnp.bfloat16), wh_ref[...],
                preferred_element_type=jnp.float32)
        + bh_ref[...]
    )
    mean = z[:, :d_out]               # mean_network output
    sigma = jnp.exp(z[:, d_out:])     # sigma_network = Linear + Exponential

    # Reparameterized sample: sigma * eps + mean (f32 elementwise).
    out_ref[...] = sigma * eps_ref[...] + mean


def _pick_tile_b(B, cap=512):
    """Batch tile: full batch if small, else largest multiple-of-16 divisor <= cap.

    Per-grid-step overhead is ~0.35us, so tiles should be as large as VMEM
    allows; cap=512 keeps double-buffered (x, eps, out) activations far below
    the scoped-VMEM limit on all generations (including v7x's 64 MiB VMEM)
    while still producing grid > 1 for large batches (v7x megacore sharding).
    """
    if B <= cap:
        return B
    t = (cap // 16) * 16
    while t >= 16:
        if B % t == 0:
            return t
        t -= 16
    return B


def gaussian_sampler_forward(x, params, eps, *, tile_b=None):
    """Runs GaussianSampler.forward (== sample) via a single Pallas kernel."""
    (w1, b1), (w2, b2), (wm, bm), (ws, bs) = params
    B, D0 = x.shape
    D1 = w1.shape[1]
    D2 = w2.shape[1]
    DO = wm.shape[1]

    # Fuse the mean and sigma heads into one (D2, 2*DO) weight / (1, 2*DO) bias.
    wh = jnp.concatenate([wm, ws], axis=1)
    bh = jnp.concatenate([bm, bs], axis=1)

    # bf16 for MXU operands (v6e/v7x bf16-native MXU; halves weight/activation
    # DMA bytes). Biases, eps and all elementwise math stay f32.
    x_bf = x.astype(jnp.bfloat16)
    w1_bf = w1.astype(jnp.bfloat16)
    w2_bf = w2.astype(jnp.bfloat16)
    wh_bf = wh.astype(jnp.bfloat16)

    if tile_b is None:
        tile_b = _pick_tile_b(B)
    assert B % tile_b == 0, "batch must be divisible by tile_b"
    # (8,128)-rule guard: non-full batch tiles must be sublane-aligned
    # (multiple of 16 covers both f32 and bf16 packing).
    assert tile_b == B or tile_b % 16 == 0

    kernel = functools.partial(gaussian_sampler_kernel, d_out=DO)

    # Grid-invariant operands: constant index_map -> fetched once, not re-DMA'd
    # per grid step.
    full = lambda shape: pl.BlockSpec(shape, lambda i: (0, 0))

    return pl.pallas_call(
        kernel,
        out_shape=jax.ShapeDtypeStruct((B, DO), jnp.float32),
        grid=(B // tile_b,),
        in_specs=[
            pl.BlockSpec((tile_b, D0), lambda i: (i, 0)),   # x (batch-tiled)
            full((D0, D1)), full((1, D1)),                  # layer 1
            full((D1, D2)), full((1, D2)),                  # layer 2
            full((D2, 2 * DO)), full((1, 2 * DO)),          # fused mean|sigma head
            pl.BlockSpec((tile_b, DO), lambda i: (i, 0)),   # eps (batch-tiled)
        ],
        out_specs=pl.BlockSpec((tile_b, DO), lambda i: (i, 0)),
        compiler_params=pltpu.CompilerParams(
            dimension_semantics=("parallel",),  # batch axis shards across TCs (v7x)
        ),
    )(x_bf, w1_bf, b1, w2_bf, b2, wh_bf, bh, eps)


# ----------------------------------------------------------------------------
# Deterministic parameter init matching GaussianSampler.init_weights:
# xavier_uniform_ for weights, zeros for biases.
# ----------------------------------------------------------------------------
def xavier_uniform(key, fan_in, fan_out):
    limit = math.sqrt(6.0 / (fan_in + fan_out))
    # Stored as (in, out); same distribution as torch's (out, in) init.
    return jax.random.uniform(
        key, (fan_in, fan_out), dtype=jnp.float32, minval=-limit, maxval=limit
    )


def make_params(key, n_units):
    """n_units = [d_in, h1, ..., h_last, d_out] as in GaussianSampler.random."""
    params = []
    # h_network layers: zip(n_units[:-2], n_units[1:-1])
    for d_in, d_out in zip(n_units[:-2], n_units[1:-1]):
        key, sub = jax.random.split(key)
        params.append((xavier_uniform(sub, d_in, d_out),
                       jnp.zeros((1, d_out), jnp.float32)))
    # mean head
    key, sub = jax.random.split(key)
    params.append((xavier_uniform(sub, n_units[-2], n_units[-1]),
                   jnp.zeros((1, n_units[-1]), jnp.float32)))
    # sigma head
    key, sub = jax.random.split(key)
    params.append((xavier_uniform(sub, n_units[-2], n_units[-1]),
                   jnp.zeros((1, n_units[-1]), jnp.float32)))
    return params


# Pure-JAX reference with the same bf16-matmul / f32-elementwise precision split.
def reference_forward(x, params, eps):
    (w1, b1), (w2, b2), (wm, bm), (ws, bs) = params
    bf = jnp.bfloat16
    f32 = jnp.float32
    h = jnp.tanh(jnp.dot(x.astype(bf), w1.astype(bf),
                         preferred_element_type=f32) + b1)
    h = jnp.tanh(jnp.dot(h.astype(bf), w2.astype(bf),
                         preferred_element_type=f32) + b2)
    mean = jnp.dot(h.astype(bf), wm.astype(bf), preferred_element_type=f32) + bm
    sigma = jnp.exp(jnp.dot(h.astype(bf), ws.astype(bf),
                            preferred_element_type=f32) + bs)
    return sigma * eps + mean


if __name__ == "__main__":
    # n_units as in GaussianSampler.random: [d_in, hidden, hidden, d_out]
    n_units = [32, 64, 64, 16]
    batch = 8

    key = jax.random.PRNGKey(0)
    k_x, k_eps, k_params = jax.random.split(key, 3)

    x = jax.random.normal(k_x, (batch, n_units[0]), dtype=jnp.float32)
    params = make_params(k_params, n_units)

    # Unit-Gaussian noise (torch.randn_like(mean)), generated deterministically
    # in plain JAX glue; the hot path (matmuls, tanh, exp, reparam) is in-kernel.
    eps = jax.random.normal(k_eps, (batch, n_units[-1]), dtype=jnp.float32)

    out = gaussian_sampler_forward(x, params, eps)
    out = jax.block_until_ready(out)

    ref = reference_forward(x, params, eps)
    assert out.shape == (batch, n_units[-1])
    assert bool(jnp.allclose(out, ref, atol=1e-3, rtol=1e-3))

    print("KERNEL_OK")
</pallas_src>

<mosaic_0001>
module attributes {stable_mosaic.version = 11 : i64} {
  func.func @gaussian_sampler_kernel(%arg0: i32, %arg1: memref<8x32xbf16, #tpu.memory_space<vmem>>, %arg2: memref<32x64xbf16, #tpu.memory_space<vmem>>, %arg3: memref<1x64xf32, #tpu.memory_space<vmem>>, %arg4: memref<64x64xbf16, #tpu.memory_space<vmem>>, %arg5: memref<1x64xf32, #tpu.memory_space<vmem>>, %arg6: memref<64x32xbf16, #tpu.memory_space<vmem>>, %arg7: memref<1x32xf32, #tpu.memory_space<vmem>>, %arg8: memref<8x16xf32, #tpu.memory_space<vmem>>, %arg9: memref<8x16xf32, #tpu.memory_space<vmem>>) attributes {dimension_semantics = [#tpu.dimension_semantics<parallel>], iteration_bounds = array<i64: 1>, scalar_prefetch = 0 : i64, scratch_operands = 0 : i64, tpu.core_type = #tpu.core_type<tc>, window_params = [{transform_indices = @transform_0, window_bounds = array<i64: 8, 32>}, {pipeline_mode = #tpu.pipeline_mode<synchronous>, transform_indices = @transform_1, window_bounds = array<i64: 32, 64>}, {pipeline_mode = #tpu.pipeline_mode<synchronous>, transform_indices = @transform_2, window_bounds = array<i64: 1, 64>}, {pipeline_mode = #tpu.pipeline_mode<synchronous>, transform_indices = @transform_3, window_bounds = array<i64: 64, 64>}, {pipeline_mode = #tpu.pipeline_mode<synchronous>, transform_indices = @transform_4, window_bounds = array<i64: 1, 64>}, {pipeline_mode = #tpu.pipeline_mode<synchronous>, transform_indices = @transform_5, window_bounds = array<i64: 64, 32>}, {pipeline_mode = #tpu.pipeline_mode<synchronous>, transform_indices = @transform_6, window_bounds = array<i64: 1, 32>}, {transform_indices = @transform_7, window_bounds = array<i64: 8, 16>}, {transform_indices = @transform_8, window_bounds = array<i64: 8, 16>}]} {
    %c0 = arith.constant 0 : index
    %c0_0 = arith.constant 0 : index
    %0 = vector.load %arg1[%c0, %c0_0] : memref<8x32xbf16, #tpu.memory_space<vmem>>, vector<8x32xbf16>
    %c0_1 = arith.constant 0 : index
    %c0_2 = arith.constant 0 : index
    %1 = vector.load %arg2[%c0_1, %c0_2] : memref<32x64xbf16, #tpu.memory_space<vmem>>, vector<32x64xbf16>
    %cst = arith.constant dense<0.000000e+00> : vector<8x64xf32>
    %2 = tpu.matmul %0, %1, %cst {dimension_numbers = #tpu.dot_dimension_numbers<[1], [0], [0], [1], [0, 0, 1, 1], [], []>} : vector<8x32xbf16>, vector<32x64xbf16>, vector<8x64xf32> -> vector<8x64xf32>
    %c0_3 = arith.constant 0 : index
    %c0_4 = arith.constant 0 : index
    %3 = vector.load %arg3[%c0_3, %c0_4] : memref<1x64xf32, #tpu.memory_space<vmem>>, vector<1x64xf32>
    %4 = vector.broadcast %3 : vector<1x64xf32> to vector<8x64xf32>
    %5 = arith.addf %2, %4 : vector<8x64xf32>
    %6 = math.tanh %5 : vector<8x64xf32>
    %7 = arith.truncf %6 : vector<8x64xf32> to vector<8x64xbf16>
    %c0_5 = arith.constant 0 : index
    %c0_6 = arith.constant 0 : index
    %8 = vector.load %arg4[%c0_5, %c0_6] : memref<64x64xbf16, #tpu.memory_space<vmem>>, vector<64x64xbf16>
    %cst_7 = arith.constant dense<0.000000e+00> : vector<8x64xf32>
    %9 = tpu.matmul %7, %8, %cst_7 {dimension_numbers = #tpu.dot_dimension_numbers<[1], [0], [0], [1], [0, 0, 1, 1], [], []>} : vector<8x64xbf16>, vector<64x64xbf16>, vector<8x64xf32> -> vector<8x64xf32>
    %c0_8 = arith.constant 0 : index
    %c0_9 = arith.constant 0 : index
    %10 = vector.load %arg5[%c0_8, %c0_9] : memref<1x64xf32, #tpu.memory_space<vmem>>, vector<1x64xf32>
    %11 = vector.broadcast %10 : vector<1x64xf32> to vector<8x64xf32>
    %12 = arith.addf %9, %11 : vector<8x64xf32>
    %13 = math.tanh %12 : vector<8x64xf32>
    %14 = arith.truncf %13 : vector<8x64xf32> to vector<8x64xbf16>
    %c0_10 = arith.constant 0 : index
    %c0_11 = arith.constant 0 : index
    %15 = vector.load %arg6[%c0_10, %c0_11] : memref<64x32xbf16, #tpu.memory_space<vmem>>, vector<64x32xbf16>
    %cst_12 = arith.constant dense<0.000000e+00> : vector<8x32xf32>
    %16 = tpu.matmul %14, %15, %cst_12 {dimension_numbers = #tpu.dot_dimension_numbers<[1], [0], [0], [1], [0, 0, 1, 1], [], []>} : vector<8x64xbf16>, vector<64x32xbf16>, vector<8x32xf32> -> vector<8x32xf32>
    %c0_13 = arith.constant 0 : index
    %c0_14 = arith.constant 0 : index
    %17 = vector.load %arg7[%c0_13, %c0_14] : memref<1x32xf32, #tpu.memory_space<vmem>>, vector<1x32xf32>
    %18 = vector.broadcast %17 : vector<1x32xf32> to vector<8x32xf32>
    %19 = arith.addf %16, %18 : vector<8x32xf32>
    %20 = vector.extract_strided_slice %19 {offsets = [0, 0], sizes = [8, 16], strides = [1, 1]} : vector<8x32xf32> to vector<8x16xf32>
    %21 = vector.extract_strided_slice %19 {offsets = [0, 16], sizes = [8, 16], strides = [1, 1]} : vector<8x32xf32> to vector<8x16xf32>
    %22 = math.exp %21 : vector<8x16xf32>
    %c0_15 = arith.constant 0 : index
    %c0_16 = arith.constant 0 : index
    %23 = vector.load %arg8[%c0_15, %c0_16] : memref<8x16xf32, #tpu.memory_space<vmem>>, vector<8x16xf32>
    %24 = arith.mulf %22, %23 : vector<8x16xf32>
    %25 = arith.addf %24, %20 : vector<8x16xf32>
    %c0_17 = arith.constant 0 : index
    %c0_18 = arith.constant 0 : index
    %26 = vector.load %arg9[%c0_17, %c0_18] : memref<8x16xf32, #tpu.memory_space<vmem>>, vector<8x16xf32>
    tpu.vector_store %arg9[%c0_17, %c0_18], %25 {strides = array<i32>} : memref<8x16xf32, #tpu.memory_space<vmem>>, vector<8x16xf32>,
    return
  }
  func.func @transform_0(%arg0: i32) -> (i32, i32) {
    %c0_i32 = arith.constant 0 : i32
    %c0_i32_0 = arith.constant 0 : i32
    return %arg0, %c0_i32 : i32, i32
  }
  func.func @transform_1(%arg0: i32) -> (i32, i32) {
    %c0_i32 = arith.constant 0 : i32
    %c0_i32_0 = arith.constant 0 : i32
    %c0_i32_1 = arith.constant 0 : i32
    return %c0_i32, %c0_i32_0 : i32, i32
  }
  func.func @transform_2(%arg0: i32) -> (i32, i32) {
    %c0_i32 = arith.constant 0 : i32
    %c0_i32_0 = arith.constant 0 : i32
    %c0_i32_1 = arith.constant 0 : i32
    return %c0_i32, %c0_i32_0 : i32, i32
  }
  func.func @transform_3(%arg0: i32) -> (i32, i32) {
    %c0_i32 = arith.constant 0 : i32
    %c0_i32_0 = arith.constant 0 : i32
    %c0_i32_1 = arith.constant 0 : i32
    return %c0_i32, %c0_i32_0 : i32, i32
  }
  func.func @transform_4(%arg0: i32) -> (i32, i32) {
    %c0_i32 = arith.constant 0 : i32
    %c0_i32_0 = arith.constant 0 : i32
    %c0_i32_1 = arith.constant 0 : i32
    return %c0_i32, %c0_i32_0 : i32, i32
  }
  func.func @transform_5(%arg0: i32) -> (i32, i32) {
    %c0_i32 = arith.constant 0 : i32
    %c0_i32_0 = arith.constant 0 : i32
    %c0_i32_1 = arith.constant 0 : i32
    return %c0_i32, %c0_i32_0 : i32, i32
  }
  func.func @transform_6(%arg0: i32) -> (i32, i32) {
    %c0_i32 = arith.constant 0 : i32
    %c0_i32_0 = arith.constant 0 : i32
    %c0_i32_1 = arith.constant 0 : i32
    return %c0_i32, %c0_i32_0 : i32, i32
  }
  func.func @transform_7(%arg0: i32) -> (i32, i32) {
    %c0_i32 = arith.constant 0 : i32
    %c0_i32_0 = arith.constant 0 : i32
    return %arg0, %c0_i32 : i32, i32
  }
  func.func @transform_8(%arg0: i32) -> (i32, i32) {
    %c0_i32 = arith.constant 0 : i32
    %c0_i32_0 = arith.constant 0 : i32
    return %arg0, %c0_i32 : i32, i32
  }
}

</mosaic_0001>

<bundles_post_ra>
// kernel: tpu_custom_call.1
= control target key start
LH: loop header
LB: loop body
LE: loop exit
PB: predicated region body
PF: predicated region fallthrough
CT: control target
= control target key end

     0   :  { %13 = vsyncpa [#allocation3], 0  ;;  %s612_s0 = inlined_call_operand.hbm [shape: bf16[8,32], index: 0, kind: input, shape index: {}]   ;;  %s613_s1 = inlined_call_operand.vmem [shape: bf16[32,64], index: 1, kind: input, shape index: {}]   ;;  %s614_s2 = inlined_call_operand.vmem [shape: f32[1,64], index: 2, kind: input, shape index: {}]   ;;  %s615_s3 = inlined_call_operand.vmem [shape: bf16[64,64], index: 3, kind: input, shape index: {}]   ;;  %s616_s4 = inlined_call_operand.vmem [shape: f32[1,64], index: 4, kind: input, shape index: {}]   ;;  %s617_s5 = inlined_call_operand.vmem [shape: bf16[64,32], index: 5, kind: input, shape index: {}]   ;;  %s618_s6 = inlined_call_operand.hbm [shape: f32[1,32], index: 6, kind: input, shape index: {}]   ;;  %s619_s7 = inlined_call_operand.vmem [shape: f32[8,16], index: 7, kind: input, shape index: {}]   ;;  %s620_s8 = inlined_call_operand.hbm [shape: f32[8,16], index: 8, kind: output, shape index: {}]  }
   0x1   :  { %14 = vsyncpa [#allocation6], 0 }
   0x2   :  { %15 = vsyncpa [#allocation4], 0  ;;  %s483_s27 = smov [#allocation2]   ;;  %s484_s29 = smov [#allocation5]  }
   0x3   :  { %s22_s28 = sshll.u32 %s483_s27, 4  ;;  %s42_s30 = sshll.u32 %s484_s29, 4  ;;  %s23_s28 = int_to_ptr.vmem [resolvable:$true] %s22_s28  ;;  %s43_s30 = int_to_ptr.vmem [resolvable:$true] %s42_s30 }
   0x4   :  { %s411_s11 = scalar_lea.hbm %s612_s0, 64 }
   0x5   :  { %p412_p0 = scmp.ne.s32.totalorder %s612_s0, %s411_s11  ;;  %p415_p1 = scmp.lt.u32.totalorder %s411_s11, %s612_s0 }
   0x7   :  { %p417_p2 = pnand %p415_p1, %p412_p0 }
   0x9   :  { %420 = shalt.err (!%p417_p2)
}
   0xa   :  { %s421_s16 = scalar_lea.vmem %s23_s28, 64  ;;  %p426_p4 = scmp.lt.s32.totalorder %s23_s28, %s23_s28 }
   0xb   :  { %p422_p3 = scmp.ne.s32.totalorder %s23_s28, %s421_s16  ;;  %p427_p5 = scmp.lt.s32.totalorder %s421_s16, %s421_s16 }
   0xd   :  { %p428_p6 = por %p427_p5, %p426_p4 }
   0xf   :  { %p429_p7 = pnand %p428_p6, %p422_p3 }
  0x11   :  { %432 = shalt.err (!%p429_p7)
}
  0x12   :  { %25 = dma.hbm_to_vmem [thread:$0]  %s612_s0, 64, %s23_s28, [#allocation3]  }
  0x13   :  { %s433_s21 = scalar_lea.hbm %s618_s6, 16 }
  0x14   :  { %p434_p8 = scmp.ne.s32.totalorder %s618_s6, %s433_s21  ;;  %p437_p9 = scmp.lt.u32.totalorder %s433_s21, %s618_s6 }
  0x16   :  { %p439_p10 = pnand %p437_p9, %p434_p8 }
  0x18   :  { %442 = shalt.err (!%p439_p10)
}
  0x19   :  { %s443_s26 = scalar_lea.vmem %s43_s30, 16  ;;  %s447_s27 = scalar_lea.vmem %s43_s30, 32 }
  0x1a   :  { %p444_p11 = scmp.ne.s32.totalorder %s43_s30, %s443_s26  ;;  %p448_p12 = scmp.lt.s32.totalorder %s43_s30, %s43_s30 }
  0x1b   :  { %p449_p13 = scmp.lt.s32.totalorder %s447_s27, %s443_s26 }
  0x1d   :  { %p450_p0 = por %p449_p13, %p448_p12 }
  0x1f   :  { %p451_p1 = pnand %p450_p0, %p444_p11 }
  0x21   :  { %454 = shalt.err (!%p451_p1)
}
  0x22   :  { %45 = dma.hbm_to_vmem [thread:$0]  %s618_s6, 16, %s43_s30, [#allocation6]  }
  0x23   :  { %477 = dma.done.wait [#allocation3], 64  }
  0x24   :  { %478 = vsyncadd [#allocation3], 4294967232 }
  0x25   :  { %479 = dma.done.wait [#allocation6], 16  }
  0x26   :  { %480 = vsyncadd [#allocation6], 4294967280  ;;  %v485_v0 = vmov 0.0   ;;  %vm486_vm0 = vmmov 0   ;;  %v395_v1 = vld [vmem:[%s613_s1] sm:$0xff]   ;;  %v396_v2 = vld [vmem:[%s613_s1 + $0x8] sm:$0xff]  }
  0x27   :  { %356 = vmatprep.subr.bf16.mxu0 %v485_v0  ;;  %360 = vmatprep.mubr.msk.bf16.mxu0 %vm486_vm0, %v485_v0  ;;  %vm79_vm1 = vcmask 261120   ;;  %v55_v3 = vld [vmem:[#allocation2] sm:$0xf]  ;;  %v398_v5 = vld [vmem:[%s615_s3 + $0x8] sm:$0xff]   ;;  %v399_v6 = vld [vmem:[%s615_s3 + $0x10] sm:$0xff]   ;;  %vm164_vm2 = vcmask 523264  }
  0x28   :  { %364 = vmatprep.subr.bf16.mxu1 %v485_v0  ;;  %372 = vmatprep.mubr.msk.bf16.mxu1 %vm486_vm0, %v485_v0  ;;  %v397_v4 = vld [vmem:[%s615_s3] sm:$0xff]   ;;  %v400_v7 = vld [vmem:[%s615_s3 + $0x18] sm:$0xff]   ;;  %v402_v17 = vld [vmem:[%s617_s5 + $0x8] sm:$0xff]   ;;  %s487_s27 = smov 16   ;;  %vm309_vm3 = vcmask 130048  }
  0x29   :  { %357 = vmatpush3.bf16.msra.mxu0 %v395_v1  ;;  %365 = vmatpush3.bf16.msra.mxu1 %v397_v4  ;;  %v327_v8 = vld [vmem:[%s614_s2] ss:$0 sm:$0xff]  ;;  %v403_v18 = vld [vmem:[%s617_s5 + $0x10] sm:$0xff]   ;;  %v404_v19 = vld [vmem:[%s617_s5 + $0x18] sm:$0xff]  }
  0x2a   :  { %358 = vmatprep.subr.bf16.mxu0 %v485_v0  ;;  %366 = vmatprep.subr.bf16.mxu1 %v485_v0  ;;  %v401_v16 = vld [vmem:[%s617_s5] sm:$0xff]   ;;  %s489_s5 = smov [#allocation7]  }
  0x2b   :  { %v294_v20 = vld [vmem:[%s619_s7] sm:$0xff]  ;;  %s317_s7 = sshll.u32 %s489_s5, 4  ;;  %s318_s7 = int_to_ptr.vmem [resolvable:$true] %s317_s7 }
  0x2c   :  { %296 = vrot.lane.b32.xlu0 %v294_v20, %s487_s27  ;;  %v331_v21 = vld [vmem:[%s616_s4] ss:$0 sm:$0xff]  ;;  %v337_v29 = vld [vmem:[#allocation5] ss:$0 sm:$0xff]  ;;  %s488_s4 = smov 112   ;;  %s455_s29 = scalar_lea.vmem %s318_s7, 128 }
  0x2d   :  { %359 = vmatpush3.bf16.msra.mxu0 %v396_v2  ;;  %367 = vmatpush3.bf16.msra.mxu1 %v398_v5  ;;  %p456_p2 = scmp.ne.s32.totalorder %s318_s7, %s455_s29  ;;  %p460_p3 = scmp.lt.s32.totalorder %s318_s7, %s318_s7 }
  0x2e   :  { %376 = vmatprep.subr.bf16.mxu0 %v485_v0  ;;  %368 = vmatprep.subr.bf16.mxu1 %v485_v0  ;;  %p461_p4 = scmp.lt.s32.totalorder %s455_s29, %s455_s29 }
  0x30   :  { %361 = vmatmul.mubr.msk.bf16.vlgmr.msra.gmra.mrb[0].mxu0 %vm79_vm1, %v55_v3  ;;  %p462_p5 = por %p461_p4, %p460_p3 }
  0x31   :  { %384 = vmatprep.mubr.msk.bf16.mxu0 %vm486_vm0, %v485_v0  ;;  %369 = vmatpush3.bf16.msra.mxu1 %v399_v6 }
  0x32   :  { %370 = vmatprep.subr.bf16.mxu1 %v485_v0  ;;  %377 = vmatpush3.bf16.msra.mxu0 %v401_v16  ;;  %p463_p6 = pnand %p462_p5, %p456_p2 }
  0x33   :  { %378 = vmatprep.subr.bf16.mxu0 %v485_v0 }
  0x35   :  { %371 = vmatpush3.bf16.msra.mxu1 %v400_v7 }
  0x36   :  { %379 = vmatpush3.bf16.msra.mxu0 %v402_v17 }
  0x37   :  { %380 = vmatprep.subr.bf16.mxu0 %v485_v0 }
  0x3a   :  { %381 = vmatpush3.bf16.msra.mxu0 %v403_v18 }
  0x3b   :  { %382 = vmatprep.subr.bf16.mxu0 %v485_v0 }
  0x3e   :  { %383 = vmatpush3.bf16.msra.mxu0 %v404_v19 }
  0x9e   :  { %v297_v37 = vpop.permute.xlu0 %296 }
 0x103   :  { %v117_v9 = vpop.f32.mrb[0].mxu0 }
 0x104   :  { %v118_v10 = vadd.f32 %v327_v8, %v117_v9  ;;  %v362_v11 = vpop.f32.mrb[1].mxu0 }
 0x105   :  { %v120_v12 = vpop.f32.mrb[2].mxu0 }
 0x106   :  { %405 = vtanh.f32 %v118_v10  ;;  %v363_v13 = vpop.f32.mrb[3].mxu0 }
 0x110   :  { %v406_v14 = vpop.eup %405 }
 0x111   :  { %v124_v15 = vpack.c.bf16 %v406_v14, %v406_v14 }
 0x113   :  { %373 = vmatmul.mubr.msk.bf16.vlgmr.msra.gmra.mrb[0].mxu1 %vm164_vm2, %v124_v15 }
 0x1e6   :  { %v202_v22 = vpop.f32.mrb[0].mxu1 }
 0x1e7   :  { %v203_v23 = vadd.f32 %v331_v21, %v202_v22  ;;  %v374_v24 = vpop.f32.mrb[1].mxu1 }
 0x1e8   :  { %v205_v25 = vpop.f32.mrb[2].mxu1 }
 0x1e9   :  { %407 = vtanh.f32 %v203_v23  ;;  %v375_v26 = vpop.f32.mrb[3].mxu1 }
 0x1f3   :  { %v408_v27 = vpop.eup %407 }
 0x1f4   :  { %v209_v28 = vpack.c.bf16 %v408_v27, %v408_v27 }
 0x1f6   :  { %385 = vmatmul.mubr.msk.bf16.vlgmr.msra.gmra.mrb[4].mxu0 %vm164_vm2, %v209_v28 }
 0x2c9   :  { %v286_v30 = vpop.f32.mrb[4].mxu0 }
 0x2ca   :  { %v287_v31 = vadd.f32 %v337_v29, %v286_v30  ;;  %v386_v32 = vpop.f32.mrb[5].mxu0 }
 0x2cb   :  { %v289_v33 = vpop.f32.mrb[6].mxu0 }
 0x2cc   :  { %301 = vrot.lane.b32.xlu0 %v287_v31, %s487_s27  ;;  %v387_v34 = vpop.f32.mrb[7].mxu0  ;;  %v292_v35 = vmul.f32 1.442695, %v287_v31 }
 0x2ce   :  { %409 = vpow2.f32 %v292_v35 }
 0x2d8   :  { %v410_v36 = vpop.eup %409 }
 0x2d9   :  { %v299_v38 = vmul.f32 %v410_v36, %v297_v37 }
 0x33e   :  { %v302_v39 = vpop.permute.xlu0 %301 }
 0x33f   :  { %v304_v40 = vadd.f32 %v302_v39, %v299_v38 }
 0x341   :  { %306 = vrot.lane.b32.xlu1 %v304_v40, %s488_s4 }
 0x3b3   :  { %v307_v41 = vpop.permute.xlu1 %306 }
 0x3b4   :  { %310 = vst.msk [vmem:[#allocation7] sm:$0xff] %vm309_vm3, %v307_v41 }
 0x3b5   :  { %466 = shalt.err (!%p463_p6)
}
 0x3b6   :  { %s467_s11 = scalar_lea.hbm %s620_s8, 128 }
 0x3b7   :  { %p468_p7 = scmp.ne.s32.totalorder %s620_s8, %s467_s11  ;;  %p471_p8 = scmp.lt.u32.totalorder %s467_s11, %s620_s8 }
 0x3b9   :  { %p473_p9 = pnand %p471_p8, %p468_p7 }
 0x3bb   :  { %476 = shalt.err (!%p473_p9)
}
 0x3bc   :  { %320 = dma.vmem_to_hbm [thread:$0]  %s318_s7, 128, %s620_s8, [#allocation4]  }
 0x3bd   :  { %481 = dma.done.wait [#allocation4], 128  }
 0x3be   :  { %482 = vsyncadd [#allocation4], 4294967168 }
 0x3bf   :  { %324 = vsyncpa [#allocation3], 1 }
 0x3c0   :  { %325 = vsyncpa [#allocation6], 1 }
 0x3c1   :  { %326 = vsyncpa [#allocation4], 1 }

</bundles_post_ra>
